<compile_context>
chip_gen: v6e
topology: v6e:2x2x1
jax: 0.10.0
libtpu: 0.0.40
codegen_flags: <defaults>
</compile_context>

<pallas_src>
import functools

import jax
import jax.numpy as jnp
from jax import lax
from jax.experimental import pallas as pl
from jax.experimental.pallas import tpu as pltpu

BATCH_SIZE = 16


def _round_up(x, m):
    return ((x + m - 1) // m) * m


def _textlikes_kernel(
    ids_ref,     # VMEM block (rows_per_step, 1) int32: token id of each kept row (pad = 0)
    seg_ref,     # VMEM block (1, rows_per_step) int32: pooled-output row of each kept row (-1 = pad)
    emb_ref,     # VMEM (Vp, E): embedding table, vocab lane-padded, resident (constant index map)
    w1_ref,      # VMEM (E, H)      -- resident
    b1_ref,      # VMEM (1, H)
    w2_ref,      # VMEM (H, C)
    b2_ref,      # VMEM (1, C)
    out_ref,     # VMEM (BATCH_SIZE, C)
    counts_ref,  # VMEM scratch (BATCH_SIZE, Vp) f32: per-window token-histogram accumulator
    *,
    inv_count,   # static: 1 / c   (avg_pool1d(kernel=c) == sum * 1/c)
):
    k = pl.program_id(0)
    nsteps = pl.num_programs(0)
    rows = ids_ref.shape[0]
    vp = counts_ref.shape[1]

    @pl.when(k == 0)
    def _():
        counts_ref[...] = jnp.zeros_like(counts_ref)

    # One-hot over the (padded) vocab for every row in this chunk.  Pad rows carry
    # seg == -1 and are killed by the segment one-hot below.
    vocab_iota = lax.broadcasted_iota(jnp.int32, (rows, vp), 1)
    onehot_tok = (vocab_iota == ids_ref[...]).astype(jnp.float32)        # (rows, Vp)

    # One-hot over the 16 pooled output rows for every row in this chunk.
    out_row = lax.broadcasted_iota(jnp.int32, (BATCH_SIZE, rows), 0)
    onehot_seg = (out_row == seg_ref[...]).astype(jnp.float32)           # (16, rows)

    # Segment histogram: counts[i, v] += #{rows in chunk with seg == i and id == v}.
    # Single small MXU matmul per grid step; no DMA descriptors, no waits.
    counts_ref[...] += jnp.dot(onehot_seg, onehot_tok,
                               preferred_element_type=jnp.float32)

    # Epilogue: table lookup + mean + the two tiny FC matmuls run exactly once.
    @pl.when(k == nsteps - 1)
    def _():
        pooled = jnp.dot(counts_ref[...], emb_ref[...].astype(jnp.float32),
                         preferred_element_type=jnp.float32) * inv_count   # (16, E)
        h = jnp.dot(pooled, w1_ref[...], preferred_element_type=jnp.float32) + b1_ref[...]
        h = jnp.maximum(h, 0.0)
        out = jnp.dot(h, w2_ref[...], preferred_element_type=jnp.float32) + b2_ref[...]
        out_ref[...] = out.astype(out_ref.dtype)


def textlikes_forward(text, emb_table, w1, b1, w2, b2, *, max_rows_per_step=2048):
    """Fused TextLikes forward.

    text:      (N,) int token ids
    emb_table: (vocab, E) embedding table
    w1: (E, 60), b1: (60,), w2: (60, C), b2: (C,)   [PyTorch Linear weights transposed]
    returns:   (BATCH_SIZE, C) float32
    """
    assert max_rows_per_step % 128 == 0
    n = int(text.shape[0])
    c = n // BATCH_SIZE
    if c == 0:
        raise ValueError(f"TextLikes needs at least BATCH_SIZE={BATCH_SIZE} tokens, got {n}")

    vocab, E = emb_table.shape
    H = w1.shape[1]
    num_class = w2.shape[1]
    total_rows = BATCH_SIZE * c                    # rows kept after truncation

    # Lane-dense vocab padding; padded table rows are zero and never counted.
    Vp = _round_up(vocab, 128)
    itemsize = jnp.dtype(emb_table.dtype).itemsize
    resident_bytes = (Vp * E * itemsize                      # embedding table (resident)
                      + BATCH_SIZE * Vp * 4                  # counts accumulator
                      + (E * H + H + H * num_class + num_class) * 4
                      + BATCH_SIZE * num_class * 4)
    if resident_bytes > (24 << 20):
        # TODO(synk): stream the table over a vocab-tile grid axis for huge vocabularies.
        raise NotImplementedError("embedding table too large for the VMEM-resident fast path")

    # Chunk the pooled-row axis (grid "arbitrary" reduction over chunks).
    if total_rows <= max_rows_per_step:
        rows_per_step = _round_up(total_rows, 8)   # single chunk; block == full array
    else:
        nchunks = pl.cdiv(total_rows, max_rows_per_step)
        rows_per_step = _round_up(pl.cdiv(total_rows, nchunks), 128)
    num_chunks = pl.cdiv(total_rows, rows_per_step)
    padded_rows = num_chunks * rows_per_step

    # Token ids (pad with 0) laid out (rows, 1) so the vocab one-hot needs no transpose;
    # segment ids (pooled output row, -1 marks padding) laid out (1, rows).
    ids = jnp.zeros((padded_rows,), jnp.int32).at[:total_rows].set(
        text[:total_rows].astype(jnp.int32)).reshape(padded_rows, 1)
    r = jnp.arange(padded_rows, dtype=jnp.int32)
    seg = jnp.where(r < total_rows, r // c, -1).reshape(1, padded_rows)

    emb_p = emb_table
    if Vp != vocab:
        emb_p = jnp.zeros((Vp, E), emb_table.dtype).at[:vocab, :].set(emb_table)

    # VMEM budget from actual buffer sizes (per-step blocks double-buffered, physical
    # tile padding included) with headroom, capped under v7x's 64 MiB physical VMEM.
    step_bytes = 2 * (rows_per_step * 128 * 4      # ids block (lane-padded)
                      + 8 * rows_per_step * 4)     # seg block (sublane-padded)
    vmem_limit = int(min(max(2 * (step_bytes + resident_bytes) + (4 << 20), 16 << 20),
                         48 << 20))

    cost = pl.CostEstimate(
        flops=2 * BATCH_SIZE * (padded_rows * Vp + Vp * E + E * H + H * num_class),
        transcendentals=0,
        bytes_accessed=(padded_rows * 8                                  # ids + seg
                        + Vp * E * itemsize                              # table
                        + (E * H + H + H * num_class + num_class) * 4    # weights
                        + BATCH_SIZE * num_class * 4),                   # output
    )

    grid_spec = pltpu.PrefetchScalarGridSpec(
        num_scalar_prefetch=0,
        grid=(num_chunks,),                                   # reduction over the pool axis
        in_specs=[
            pl.BlockSpec((rows_per_step, 1), lambda k: (k, 0)),          # ids (per-chunk)
            pl.BlockSpec((1, rows_per_step), lambda k: (0, k)),          # seg (per-chunk)
            pl.BlockSpec((Vp, E), lambda k: (0, 0)),                     # emb table (resident)
            pl.BlockSpec((E, H), lambda k: (0, 0)),                      # w1 (resident)
            pl.BlockSpec((1, H), lambda k: (0, 0)),                      # b1
            pl.BlockSpec((H, num_class), lambda k: (0, 0)),              # w2
            pl.BlockSpec((1, num_class), lambda k: (0, 0)),              # b2
        ],
        out_specs=pl.BlockSpec((BATCH_SIZE, num_class), lambda k: (0, 0)),
        scratch_shapes=[pltpu.VMEM((BATCH_SIZE, Vp), jnp.float32)],      # counts accumulator
    )

    kernel = functools.partial(_textlikes_kernel, inv_count=1.0 / c)
    return pl.pallas_call(
        kernel,
        out_shape=jax.ShapeDtypeStruct((BATCH_SIZE, num_class), jnp.float32),
        grid_spec=grid_spec,
        compiler_params=pltpu.CompilerParams(
            dimension_semantics=("arbitrary",),    # counts accumulator carried across steps
            vmem_limit_bytes=vmem_limit,
        ),
        cost_estimate=cost,
    )(ids, seg, emb_p, w1, b1.reshape(1, -1), w2, b2.reshape(1, -1))


def reference_forward(text, emb_table, w1, b1, w2, b2):
    n = text.shape[0]
    c = n // BATCH_SIZE
    embedded = jnp.take(emb_table, text[: BATCH_SIZE * c], axis=0).astype(jnp.float32)
    pooled = embedded.reshape(BATCH_SIZE, c, -1).mean(axis=1)
    h = jnp.maximum(pooled @ w1 + b1, 0.0)
    return h @ w2 + b2


if __name__ == "__main__":
    vocab_size, embed_dim, num_class = 50, 32, 4

    key = jax.random.PRNGKey(0)
    k_emb, k_w1, k_w2, k_txt = jax.random.split(key, 4)

    initrange = 0.5
    emb_table = jax.random.uniform(k_emb, (vocab_size, embed_dim),
                                   jnp.float32, -initrange, initrange)
    # PyTorch Linear weight is (out, in); stored transposed (in, out) for the kernel.
    w1 = jax.random.uniform(k_w1, (embed_dim, 60), jnp.float32, -initrange, initrange)
    b1 = jnp.zeros((60,), jnp.float32)
    w2 = jax.random.uniform(k_w2, (60, num_class), jnp.float32, -initrange, initrange)
    b2 = jnp.zeros((num_class,), jnp.float32)

    # Case 1: multi-chunk (N=645 -> c=40 -> 640 pooled rows -> 3 chunks of 256),
    # exercising truncation, chunk padding and the cross-step counts accumulator.
    seq_len = 16 * 40 + 5
    text = jax.random.randint(k_txt, (seq_len,), 0, vocab_size, dtype=jnp.int32)
    fwd = jax.jit(functools.partial(textlikes_forward, max_rows_per_step=256))
    out = jax.block_until_ready(fwd(text, emb_table, w1, b1, w2, b2))
    ref = reference_forward(text, emb_table, w1, b1, w2, b2)
    assert out.shape == (BATCH_SIZE, num_class)
    assert jnp.allclose(out, ref, atol=5e-4, rtol=5e-4), "mismatch vs reference (multi-chunk)"

    # Case 2: tiny sequence (N=35 -> c=2, single chunk, truncation to 32 tokens).
    text_small = jax.random.randint(jax.random.PRNGKey(1), (35,), 0, vocab_size,
                                    dtype=jnp.int32)
    out_small = jax.block_until_ready(
        jax.jit(textlikes_forward)(text_small, emb_table, w1, b1, w2, b2))
    ref_small = reference_forward(text_small, emb_table, w1, b1, w2, b2)
    assert jnp.allclose(out_small, ref_small, atol=5e-4, rtol=5e-4), \
        "mismatch vs reference (single-chunk)"

    print("KERNEL_OK")
</pallas_src>

<mosaic_0001>
module attributes {stable_mosaic.version = 11 : i64} {
  func.func @_textlikes_kernel(%arg0: i32, %arg1: memref<256x1xi32, #tpu.memory_space<vmem>>, %arg2: memref<1x256xi32, #tpu.memory_space<vmem>>, %arg3: memref<128x32xf32, #tpu.memory_space<vmem>>, %arg4: memref<32x60xf32, #tpu.memory_space<vmem>>, %arg5: memref<1x60xf32, #tpu.memory_space<vmem>>, %arg6: memref<60x4xf32, #tpu.memory_space<vmem>>, %arg7: memref<1x4xf32, #tpu.memory_space<vmem>>, %arg8: memref<16x4xf32, #tpu.memory_space<vmem>>, %arg9: memref<16x128xf32, #tpu.memory_space<vmem>>) attributes {dimension_semantics = [#tpu.dimension_semantics<arbitrary>], iteration_bounds = array<i64: 3>, scalar_prefetch = 0 : i64, scratch_operands = 1 : i64, tpu.core_type = #tpu.core_type<tc>, window_params = [{transform_indices = @transform_0, window_bounds = array<i64: 256, 1>}, {transform_indices = @transform_1, window_bounds = array<i64: 1, 256>}, {pipeline_mode = #tpu.pipeline_mode<synchronous>, transform_indices = @transform_2, window_bounds = array<i64: 128, 32>}, {pipeline_mode = #tpu.pipeline_mode<synchronous>, transform_indices = @transform_3, window_bounds = array<i64: 32, 60>}, {pipeline_mode = #tpu.pipeline_mode<synchronous>, transform_indices = @transform_4, window_bounds = array<i64: 1, 60>}, {pipeline_mode = #tpu.pipeline_mode<synchronous>, transform_indices = @transform_5, window_bounds = array<i64: 60, 4>}, {pipeline_mode = #tpu.pipeline_mode<synchronous>, transform_indices = @transform_6, window_bounds = array<i64: 1, 4>}, {pipeline_mode = #tpu.pipeline_mode<synchronous>, transform_indices = @transform_7, window_bounds = array<i64: 16, 4>}]} {
    %c0_i32 = arith.constant 0 : i32
    %0 = arith.cmpi eq, %arg0, %c0_i32 : i32
    %1 = arith.extui %0 : i1 to i32
    %c0_i32_0 = arith.constant 0 : i32
    %2 = arith.cmpi ne, %1, %c0_i32_0 : i32
    scf.if %2 {
      %cst_9 = arith.constant 0.000000e+00 : f32
      %22 = vector.broadcast %cst_9 : f32 to vector<16x128xf32>
      %c0_10 = arith.constant 0 : index
      %c0_11 = arith.constant 0 : index
      %23 = vector.load %arg9[%c0_10, %c0_11] : memref<16x128xf32, #tpu.memory_space<vmem>>, vector<16x128xf32>
      tpu.vector_store %arg9[%c0_10, %c0_11], %22 {strides = array<i32>} : memref<16x128xf32, #tpu.memory_space<vmem>>, vector<16x128xf32>,
    } else {
    }
    %3 = tpu.iota {dimensions = array<i32: 1>} : vector<256x128xi32>
    %c0 = arith.constant 0 : index
    %c0_1 = arith.constant 0 : index
    %4 = vector.load %arg1[%c0, %c0_1] : memref<256x1xi32, #tpu.memory_space<vmem>>, vector<256x1xi32>
    %5 = vector.broadcast %4 : vector<256x1xi32> to vector<256x128xi32>
    %6 = arith.cmpi eq, %3, %5 : vector<256x128xi32>
    %7 = arith.extui %6 : vector<256x128xi1> to vector<256x128xi32>
    %8 = arith.sitofp %7 : vector<256x128xi32> to vector<256x128xf32>
    %9 = tpu.iota {dimensions = array<i32: 0>} : vector<16x256xi32>
    %c0_2 = arith.constant 0 : index
    %c0_3 = arith.constant 0 : index
    %10 = vector.load %arg2[%c0_2, %c0_3] : memref<1x256xi32, #tpu.memory_space<vmem>>, vector<1x256xi32>
    %11 = vector.broadcast %10 : vector<1x256xi32> to vector<16x256xi32>
    %12 = arith.cmpi eq, %9, %11 : vector<16x256xi32>
    %13 = arith.extui %12 : vector<16x256xi1> to vector<16x256xi32>
    %14 = arith.sitofp %13 : vector<16x256xi32> to vector<16x256xf32>
    %c0_4 = arith.constant 0 : index
    %c0_5 = arith.constant 0 : index
    %15 = vector.load %arg9[%c0_4, %c0_5] : memref<16x128xf32, #tpu.memory_space<vmem>>, vector<16x128xf32>
    %cst = arith.constant dense<0.000000e+00> : vector<16x128xf32>
    %16 = tpu.matmul %14, %8, %cst {dimension_numbers = #tpu.dot_dimension_numbers<[1], [0], [0], [1], [0, 0, 1, 1], [], []>} : vector<16x256xf32>, vector<256x128xf32>, vector<16x128xf32> -> vector<16x128xf32>
    %17 = arith.addf %15, %16 : vector<16x128xf32>
    %c0_6 = arith.constant 0 : index
    %c0_7 = arith.constant 0 : index
    %18 = vector.load %arg9[%c0_6, %c0_7] : memref<16x128xf32, #tpu.memory_space<vmem>>, vector<16x128xf32>
    tpu.vector_store %arg9[%c0_6, %c0_7], %17 {strides = array<i32>} : memref<16x128xf32, #tpu.memory_space<vmem>>, vector<16x128xf32>,
    %c2_i32 = arith.constant 2 : i32
    %19 = arith.cmpi eq, %arg0, %c2_i32 : i32
    %20 = arith.extui %19 : i1 to i32
    %c0_i32_8 = arith.constant 0 : i32
    %21 = arith.cmpi ne, %20, %c0_i32_8 : i32
    scf.if %21 {
      %c0_9 = arith.constant 0 : index
      %c0_10 = arith.constant 0 : index
      %22 = vector.load %arg9[%c0_9, %c0_10] : memref<16x128xf32, #tpu.memory_space<vmem>>, vector<16x128xf32>
      %c0_11 = arith.constant 0 : index
      %c0_12 = arith.constant 0 : index
      %23 = vector.load %arg3[%c0_11, %c0_12] : memref<128x32xf32, #tpu.memory_space<vmem>>, vector<128x32xf32>
      %cst_13 = arith.constant dense<0.000000e+00> : vector<16x32xf32>
      %24 = tpu.matmul %22, %23, %cst_13 {dimension_numbers = #tpu.dot_dimension_numbers<[1], [0], [0], [1], [0, 0, 1, 1], [], []>} : vector<16x128xf32>, vector<128x32xf32>, vector<16x32xf32> -> vector<16x32xf32>
      %cst_14 = arith.constant 2.500000e-02 : f32
      %25 = vector.broadcast %cst_14 : f32 to vector<16x32xf32>
      %26 = arith.mulf %24, %25 : vector<16x32xf32>
      %c0_15 = arith.constant 0 : index
      %c0_16 = arith.constant 0 : index
      %27 = vector.load %arg4[%c0_15, %c0_16] : memref<32x60xf32, #tpu.memory_space<vmem>>, vector<32x60xf32>
      %cst_17 = arith.constant dense<0.000000e+00> : vector<16x60xf32>
      %28 = tpu.matmul %26, %27, %cst_17 {dimension_numbers = #tpu.dot_dimension_numbers<[1], [0], [0], [1], [0, 0, 1, 1], [], []>} : vector<16x32xf32>, vector<32x60xf32>, vector<16x60xf32> -> vector<16x60xf32>
      %c0_18 = arith.constant 0 : index
      %c0_19 = arith.constant 0 : index
      %29 = vector.load %arg5[%c0_18, %c0_19] : memref<1x60xf32, #tpu.memory_space<vmem>>, vector<1x60xf32>
      %30 = vector.broadcast %29 : vector<1x60xf32> to vector<16x60xf32>
      %31 = arith.addf %28, %30 : vector<16x60xf32>
      %cst_20 = arith.constant 0.000000e+00 : f32
      %32 = vector.broadcast %cst_20 : f32 to vector<16x60xf32>
      %33 = arith.maximumf %31, %32 : vector<16x60xf32>
      %c0_21 = arith.constant 0 : index
      %c0_22 = arith.constant 0 : index
      %34 = vector.load %arg6[%c0_21, %c0_22] : memref<60x4xf32, #tpu.memory_space<vmem>>, vector<60x4xf32>
      %cst_23 = arith.constant dense<0.000000e+00> : vector<16x4xf32>
      %35 = tpu.matmul %33, %34, %cst_23 {dimension_numbers = #tpu.dot_dimension_numbers<[1], [0], [0], [1], [0, 0, 1, 1], [], []>} : vector<16x60xf32>, vector<60x4xf32>, vector<16x4xf32> -> vector<16x4xf32>
      %c0_24 = arith.constant 0 : index
      %c0_25 = arith.constant 0 : index
      %36 = vector.load %arg7[%c0_24, %c0_25] : memref<1x4xf32, #tpu.memory_space<vmem>>, vector<1x4xf32>
      %37 = vector.broadcast %36 : vector<1x4xf32> to vector<16x4xf32>
      %38 = arith.addf %35, %37 : vector<16x4xf32>
      %c0_26 = arith.constant 0 : index
      %c0_27 = arith.constant 0 : index
      %39 = vector.load %arg8[%c0_26, %c0_27] : memref<16x4xf32, #tpu.memory_space<vmem>>, vector<16x4xf32>
      tpu.vector_store %arg8[%c0_26, %c0_27], %38 {strides = array<i32>} : memref<16x4xf32, #tpu.memory_space<vmem>>, vector<16x4xf32>,
    } else {
    }
    return
  }
  func.func @transform_0(%arg0: i32) -> (i32, i32) {
    %c0_i32 = arith.constant 0 : i32
    %c0_i32_0 = arith.constant 0 : i32
    return %arg0, %c0_i32 : i32, i32
  }
  func.func @transform_1(%arg0: i32) -> (i32, i32) {
    %c0_i32 = arith.constant 0 : i32
    %c0_i32_0 = arith.constant 0 : i32
    return %c0_i32, %arg0 : i32, i32
  }
  func.func @transform_2(%arg0: i32) -> (i32, i32) {
    %c0_i32 = arith.constant 0 : i32
    %c0_i32_0 = arith.constant 0 : i32
    %c0_i32_1 = arith.constant 0 : i32
    return %c0_i32, %c0_i32_0 : i32, i32
  }
  func.func @transform_3(%arg0: i32) -> (i32, i32) {
    %c0_i32 = arith.constant 0 : i32
    %c0_i32_0 = arith.constant 0 : i32
    %c0_i32_1 = arith.constant 0 : i32
    return %c0_i32, %c0_i32_0 : i32, i32
  }
  func.func @transform_4(%arg0: i32) -> (i32, i32) {
    %c0_i32 = arith.constant 0 : i32
    %c0_i32_0 = arith.constant 0 : i32
    %c0_i32_1 = arith.constant 0 : i32
    return %c0_i32, %c0_i32_0 : i32, i32
  }
  func.func @transform_5(%arg0: i32) -> (i32, i32) {
    %c0_i32 = arith.constant 0 : i32
    %c0_i32_0 = arith.constant 0 : i32
    %c0_i32_1 = arith.constant 0 : i32
    return %c0_i32, %c0_i32_0 : i32, i32
  }
  func.func @transform_6(%arg0: i32) -> (i32, i32) {
    %c0_i32 = arith.constant 0 : i32
    %c0_i32_0 = arith.constant 0 : i32
    %c0_i32_1 = arith.constant 0 : i32
    return %c0_i32, %c0_i32_0 : i32, i32
  }
  func.func @transform_7(%arg0: i32) -> (i32, i32) {
    %c0_i32 = arith.constant 0 : i32
    %c0_i32_0 = arith.constant 0 : i32
    %c0_i32_1 = arith.constant 0 : i32
    return %c0_i32, %c0_i32_0 : i32, i32
  }
}

</mosaic_0001>

<bundles_post_ra>
// kernel: textlikes_forward.1
= control target key start
LH: loop header
LB: loop body
LE: loop exit
PB: predicated region body
PF: predicated region fallthrough
CT: control target
= control target key end

     0   :  { %s1280_s24 = smov 0   ;;  %s1564_s0 = inlined_call_operand.vmem [shape: s32[768,1], index: 0, kind: input, shape index: {}]   ;;  %s1565_s1 = inlined_call_operand.vmem [shape: s32[1,768], index: 1, kind: input, shape index: {}]   ;;  %s1566_s2 = inlined_call_operand.vmem [shape: f32[128,32], index: 2, kind: input, shape index: {}]   ;;  %s1567_s3 = inlined_call_operand.vmem [shape: f32[32,60], index: 3, kind: input, shape index: {}]   ;;  %s1568_s4 = inlined_call_operand.vmem [shape: f32[1,60], index: 4, kind: input, shape index: {}]   ;;  %s1569_s5 = inlined_call_operand.vmem [shape: f32[60,4], index: 5, kind: input, shape index: {}]   ;;  %s1570_s6 = inlined_call_operand.vmem [shape: f32[1,4], index: 6, kind: input, shape index: {}]   ;;  %s1571_s7 = inlined_call_operand.vmem [shape: f32[16,4], index: 7, kind: output, shape index: {}]  }
   0x1 LB: > { %s1286_s25 = sadd.s32 4294967295, %s1235_s24   ;;  %p960_p0 = scmp.ge.s32.totalorder %s1235_s24, 1  ;;  %s1235_s24 = sphi %s1280_s24, %s17_s24  }
   0x2   : > { %p243_p1 = scmp.lt.s32.totalorder %s1235_s24, 4 }
   0x4   : > { %p244_p2 = pnand %p960_p0, %p243_p1 }
   0x5   : > { %s961_s26 = sshll.u32 (!%p244_p2), %s1286_s25, 5  ;;  %s963_s27 = sshll.u32 (!%p244_p2), %s1286_s25, 1 }
   0x6   : > { %247 = sbr.rel (%p244_p2) target bundleno = 1038 (0x40e), region = 48  ;;  %p275_p3 = scmp.lt.s32.totalorder (!%p244_p2), %s961_s26, 95 }
   0x7   : > { %p281_p4 = scmp.lt.s32.totalorder (!%p244_p2), %s963_s27, 5  ;;  %p964_p5 = scmp.ne.s32.totalorder (!%p244_p2), %s1286_s25, 0 }
   0xb   : > { %s1573_s26 = smov (!%p275_p3, %s961_s26), 95  ;;  %s1575_s27 = smov (!%p281_p4, %s963_s27), 5 }
   0xc   : > { %s962_s28 = sshll.u32 %s1573_s26, 3  ;;  %s283_s11 = scalar_lea.vmem %s1565_s1, %s1575_s27 }
   0xd   : > { %s1297_s8 = scalar_lea.vmem %s1564_s0, %s962_s28  ;;  %288 = sbr.rel (%p964_p5) target bundleno = 20 (0x14), region = 52 }
  0x12   : > { %v1237_v0 = vmov 0.0  }
  0x13   : > { %289 = vst [vmem:[#allocation2] sm:$0xff] %v1237_v0  ;;  %290 = vst [vmem:[#allocation2 + $0x8] sm:$0xff] %v1237_v0 }
  0x14 PF: > { %v324_v1 = vld [vmem:[%s1297_s8 + $0xf8] sm:$0xff]  ;;  %v323_v2 = vld [vmem:[%s1297_s8 + $0xf0] sm:$0xff]  ;;  %v1238_v3 = vmov 0   ;;  %v322_v6 = vld [vmem:[%s1297_s8 + $0xe8] sm:$0xff]  ;;  %v291_v30 = vlaneseq  ;;  %v1239_v42 = vmov 1.0   ;;  %p1037_p6 = scmp.ne.s32.totalorder %s1286_s25, 2 }
  0x15   : > { %1228 = vset.pattern.permute.xlu1 %v1238_v3  ;;  %1227 = vset.pattern.permute.xlu0 %v1238_v3  ;;  %v308_v4 = vld [vmem:[%s1297_s8 + $0x78] sm:$0xff]  ;;  %v307_v5 = vld [vmem:[%s1297_s8 + $0x70] sm:$0xff]  ;;  %v306_v7 = vld [vmem:[%s1297_s8 + $0x68] sm:$0xff] }
  0x16   : > { %419 = vperm.xlu0 %1227, %v324_v1   ;;  %416 = vperm.xlu1 %1228, %v323_v2   ;;  %v321_v8 = vld [vmem:[%s1297_s8 + $0xe0] sm:$0xff]  ;;  %v320_v10 = vld [vmem:[%s1297_s8 + $0xd8] sm:$0xff]  ;;  %v319_v12 = vld [vmem:[%s1297_s8 + $0xd0] sm:$0xff]  ;;  %v1332_v31 = vshrl.u32 %v291_v30, 7  ;;  %v1358_v43 = vand.u32 127, %v291_v30 }
  0x17   : > { %v305_v9 = vld [vmem:[%s1297_s8 + $0x60] sm:$0xff]  ;;  %v304_v11 = vld [vmem:[%s1297_s8 + $0x58] sm:$0xff]  ;;  %v303_v13 = vld [vmem:[%s1297_s8 + $0x50] sm:$0xff] }
  0x18   : > { %v318_v14 = vld [vmem:[%s1297_s8 + $0xc8] sm:$0xff]  ;;  %v317_v16 = vld [vmem:[%s1297_s8 + $0xc0] sm:$0xff]  ;;  %v316_v18 = vld [vmem:[%s1297_s8 + $0xb8] sm:$0xff]  ;;  %v527_v34 = vsub.s32 1, %v1332_v31  ;;  %v523_v36 = vsub.s32 0, %v1332_v31  ;;  %v1344_v38 = vadd.s32 8, %v1332_v31 }
  0x19   : > { %v302_v15 = vld [vmem:[%s1297_s8 + $0x48] sm:$0xff]  ;;  %v301_v17 = vld [vmem:[%s1297_s8 + $0x40] sm:$0xff]  ;;  %v300_v19 = vld [vmem:[%s1297_s8 + $0x38] sm:$0xff] }
  0x1a   : > { %371 = vperm.xlu0 %1227, %v308_v4   ;;  %368 = vperm.xlu1 %1228, %v307_v5   ;;  %v315_v20 = vld [vmem:[%s1297_s8 + $0xb0] sm:$0xff]  ;;  %v314_v22 = vld [vmem:[%s1297_s8 + $0xa8] sm:$0xff]  ;;  %v313_v24 = vld [vmem:[%s1297_s8 + $0xa0] sm:$0xff] }
  0x1b   : > { %v299_v21 = vld [vmem:[%s1297_s8 + $0x30] sm:$0xff]  ;;  %v298_v23 = vld [vmem:[%s1297_s8 + $0x28] sm:$0xff]  ;;  %v297_v25 = vld [vmem:[%s1297_s8 + $0x20] sm:$0xff] }
  0x1c   : > { %v312_v26 = vld [vmem:[%s1297_s8 + $0x98] sm:$0xff]  ;;  %v311_v28 = vld [vmem:[%s1297_s8 + $0x90] sm:$0xff]  ;;  %v310_v32 = vld [vmem:[%s1297_s8 + $0x88] sm:$0xff] }
  0x1d   : > { %v296_v27 = vld [vmem:[%s1297_s8 + $0x18] sm:$0xff]  ;;  %v295_v29 = vld [vmem:[%s1297_s8 + $0x10] sm:$0xff]  ;;  %v294_v33 = vld [vmem:[%s1297_s8 + $0x8] sm:$0xff] }
  0x1e   : > { %413 = vperm.xlu0 %1227, %v322_v6   ;;  %365 = vperm.xlu1 %1228, %v306_v7   ;;  %v520_v35 = vld [vmem:[%s283_s11] sm:$0x3] }
  0x1f   : > { %v528_v37 = vrot.slane %v520_v35, %v527_v34  ;;  %v1346_v39 = vrot.slane %v520_v35, %v523_v36  ;;  %v309_v40 = vld [vmem:[%s1297_s8 + $0x80] sm:$0xff] }
  0x20   : > { %v293_v41 = vld [vmem:[%s1297_s8] sm:$0xff] }
  0x21   : > { %vm530_vm0 = vcmp.eq.s32.totalorder %v1332_v31, %v528_v37  ;;  %vm532_vm1 = vcmp.eq.s32.totalorder %v1344_v38, %v528_v37  ;;  %vm529_vm2 = vcmp.eq.s32.totalorder %v1332_v31, %v1346_v39  ;;  %vm531_vm3 = vcmp.eq.s32.totalorder %v1344_v38, %v1346_v39 }
  0x22   : > { %410 = vperm.xlu0 %1227, %v321_v8   ;;  %362 = vperm.xlu1 %1228, %v305_v9  }
  0x23   : > { %1033 = vmatprep.mubr.msk.f32.mxu0 %vm530_vm0, %v1239_v42  ;;  %1035 = vmatprep.mubr.msk.f32.mxu1 %vm532_vm1, %v1239_v42 }
  0x26   : > { %407 = vperm.xlu0 %1227, %v320_v10   ;;  %359 = vperm.xlu1 %1228, %v304_v11  }
  0x2a   : > { %404 = vperm.xlu0 %1227, %v319_v12   ;;  %356 = vperm.xlu1 %1228, %v303_v13  }
  0x2e   : > { %401 = vperm.xlu0 %1227, %v318_v14   ;;  %353 = vperm.xlu1 %1228, %v302_v15   ;;  %v541_v14 = vld [vmem:[#allocation2] sm:$0xff] }
  0x32   : > { %398 = vperm.xlu0 %1227, %v317_v16   ;;  %350 = vperm.xlu1 %1228, %v301_v17   ;;  %v542_v16 = vld [vmem:[#allocation2 + $0x8] sm:$0xff] }
  0x36   : > { %395 = vperm.xlu0 %1227, %v316_v18   ;;  %347 = vperm.xlu1 %1228, %v300_v19  }
  0x3a   : > { %392 = vperm.xlu0 %1227, %v315_v20   ;;  %344 = vperm.xlu1 %1228, %v299_v21  }
  0x3e   : > { %389 = vperm.xlu0 %1227, %v314_v22   ;;  %341 = vperm.xlu1 %1228, %v298_v23  }
  0x42   : > { %386 = vperm.xlu0 %1227, %v313_v24   ;;  %338 = vperm.xlu1 %1228, %v297_v25  }
  0x46   : > { %383 = vperm.xlu0 %1227, %v312_v26   ;;  %335 = vperm.xlu1 %1228, %v296_v27  }
  0x4a   : > { %380 = vperm.xlu0 %1227, %v311_v28   ;;  %332 = vperm.xlu1 %1228, %v295_v29  }
  0x4e   : > { %377 = vperm.xlu0 %1227, %v310_v32   ;;  %329 = vperm.xlu1 %1228, %v294_v33  }
  0x52   : > { %374 = vperm.xlu0 %1227, %v309_v40   ;;  %326 = vperm.xlu1 %1228, %v293_v41  }
  0x91   : > { %v420_v44 = vpop.permute.xlu0 %419  ;;  %v417_v45 = vpop.permute.xlu1 %416 }
  0x92   : > { %vm452_vm4 = vcmp.eq.s32.totalorder %v1358_v43, %v420_v44  ;;  %vm451_vm6 = vcmp.eq.s32.totalorder %v1358_v43, %v417_v45 }
  0x93   : > { %1047 = vmatprep.subr.msk.mxu0 %vm452_vm4, %v1239_v42  ;;  %1184 = vmatprep.subr.msk.mxu1 %vm452_vm4, %v1239_v42 }
  0x95   : > { %v372_v46 = vpop.permute.xlu0 %371  ;;  %v369_v47 = vpop.permute.xlu1 %368 }
  0x96   : > { %vm436_vm5 = vcmp.eq.s32.totalorder %v1358_v43, %v372_v46  ;;  %vm435_vm7 = vcmp.eq.s32.totalorder %v1358_v43, %v369_v47 }
  0x97   : > { %1048 = vmatpush3.msk.msra.mxu0 %vm436_vm5, %v1239_v42  ;;  %1200 = vmatpush3.msk.msra.mxu1 %vm436_vm5, %v1239_v42 }
  0x98   : > { %1049 = vmatprep.subr.msk.mxu0 %vm451_vm6, %v1239_v42  ;;  %1185 = vmatprep.subr.msk.mxu1 %vm451_vm6, %v1239_v42 }
  0x99   : > { %v414_v48 = vpop.permute.xlu0 %413  ;;  %v366_v49 = vpop.permute.xlu1 %365  ;;  %1050 = vmatpush3.msk.msra.mxu0 %vm435_vm7, %v1239_v42  ;;  %1201 = vmatpush3.msk.msra.mxu1 %vm435_vm7, %v1239_v42 }
  0x9a   : > { %vm450_vm8 = vcmp.eq.s32.totalorder %v1358_v43, %v414_v48  ;;  %vm434_vm9 = vcmp.eq.s32.totalorder %v1358_v43, %v366_v49 }
  0x9b   : > { %1051 = vmatprep.subr.msk.mxu0 %vm450_vm8, %v1239_v42  ;;  %1186 = vmatprep.subr.msk.mxu1 %vm450_vm8, %v1239_v42 }
  0x9c   : > { %1052 = vmatpush3.msk.msra.mxu0 %vm434_vm9, %v1239_v42  ;;  %1202 = vmatpush3.msk.msra.mxu1 %vm434_vm9, %v1239_v42 }
  0x9d   : > { %v411_v50 = vpop.permute.xlu0 %410  ;;  %v363_v51 = vpop.permute.xlu1 %362 }
  0x9e   : > { %vm449_vm10 = vcmp.eq.s32.totalorder %v1358_v43, %v411_v50  ;;  %vm433_vm11 = vcmp.eq.s32.totalorder %v1358_v43, %v363_v51 }
  0x9f   : > { %1053 = vmatprep.subr.msk.mxu0 %vm449_vm10, %v1239_v42  ;;  %1187 = vmatprep.subr.msk.mxu1 %vm449_vm10, %v1239_v42 }
  0xa0   : > { %1054 = vmatpush3.msk.msra.mxu0 %vm433_vm11, %v1239_v42  ;;  %1203 = vmatpush3.msk.msra.mxu1 %vm433_vm11, %v1239_v42 }
  0xa1   : > { %v408_v52 = vpop.permute.xlu0 %407  ;;  %v360_v53 = vpop.permute.xlu1 %359 }
  0xa2   : > { %vm448_vm12 = vcmp.eq.s32.totalorder %v1358_v43, %v408_v52  ;;  %vm432_vm13 = vcmp.eq.s32.totalorder %v1358_v43, %v360_v53 }
  0xa3   : > { %1055 = vmatprep.subr.msk.mxu0 %vm448_vm12, %v1239_v42  ;;  %1188 = vmatprep.subr.msk.mxu1 %vm448_vm12, %v1239_v42 }
  0xa4   : > { %1056 = vmatpush3.msk.msra.mxu0 %vm432_vm13, %v1239_v42  ;;  %1204 = vmatpush3.msk.msra.mxu1 %vm432_vm13, %v1239_v42 }
  0xa5   : > { %v405_v54 = vpop.permute.xlu0 %404  ;;  %v357_v55 = vpop.permute.xlu1 %356 }
  0xa6   : > { %vm447_vm14 = vcmp.eq.s32.totalorder %v1358_v43, %v405_v54  ;;  %vm431_vm15 = vcmp.eq.s32.totalorder %v1358_v43, %v357_v55 }
  0xa7   : > { %1057 = vmatprep.subr.msk.mxu0 %vm447_vm14, %v1239_v42  ;;  %1189 = vmatprep.subr.msk.mxu1 %vm447_vm14, %v1239_v42 }
  0xa8   : > { %1058 = vmatpush3.msk.msra.mxu0 %vm431_vm15, %v1239_v42  ;;  %1205 = vmatpush3.msk.msra.mxu1 %vm431_vm15, %v1239_v42 }
  0xa9   : > { %v402_v56 = vpop.permute.xlu0 %401  ;;  %v354_v57 = vpop.permute.xlu1 %353 }
  0xaa   : > { %vm446_vm0 = vcmp.eq.s32.totalorder %v1358_v43, %v402_v56  ;;  %vm430_vm1 = vcmp.eq.s32.totalorder %v1358_v43, %v354_v57 }
  0xab   : > { %1059 = vmatprep.subr.msk.mxu0 %vm446_vm0, %v1239_v42  ;;  %1190 = vmatprep.subr.msk.mxu1 %vm446_vm0, %v1239_v42 }
  0xac   : > { %1060 = vmatpush3.msk.msra.mxu0 %vm430_vm1, %v1239_v42  ;;  %1206 = vmatpush3.msk.msra.mxu1 %vm430_vm1, %v1239_v42 }
  0xad   : > { %v399_v58 = vpop.permute.xlu0 %398  ;;  %v351_v59 = vpop.permute.xlu1 %350 }
  0xae   : > { %vm445_vm4 = vcmp.eq.s32.totalorder %v1358_v43, %v399_v58  ;;  %vm429_vm5 = vcmp.eq.s32.totalorder %v1358_v43, %v351_v59 }
  0xaf   : > { %1061 = vmatprep.subr.msk.mxu0 %vm445_vm4, %v1239_v42  ;;  %1191 = vmatprep.subr.msk.mxu1 %vm445_vm4, %v1239_v42 }
  0xb0   : > { %1062 = vmatpush3.msk.msra.mxu0 %vm429_vm5, %v1239_v42  ;;  %1207 = vmatpush3.msk.msra.mxu1 %vm429_vm5, %v1239_v42 }
  0xb1   : > { %v396_v60 = vpop.permute.xlu0 %395  ;;  %v348_v61 = vpop.permute.xlu1 %347 }
  0xb2   : > { %vm444_vm6 = vcmp.eq.s32.totalorder %v1358_v43, %v396_v60  ;;  %vm428_vm7 = vcmp.eq.s32.totalorder %v1358_v43, %v348_v61 }
  0xb3   : > { %1063 = vmatprep.subr.msk.mxu0 %vm444_vm6, %v1239_v42  ;;  %1192 = vmatprep.subr.msk.mxu1 %vm444_vm6, %v1239_v42 }
  0xb4   : > { %1064 = vmatpush3.msk.msra.mxu0 %vm428_vm7, %v1239_v42  ;;  %1208 = vmatpush3.msk.msra.mxu1 %vm428_vm7, %v1239_v42 }
  0xb5   : > { %v393_v62 = vpop.permute.xlu0 %392  ;;  %v345_v63 = vpop.permute.xlu1 %344 }
  0xb6   : > { %vm443_vm8 = vcmp.eq.s32.totalorder %v1358_v43, %v393_v62  ;;  %vm427_vm9 = vcmp.eq.s32.totalorder %v1358_v43, %v345_v63 }
  0xb7   : > { %1065 = vmatprep.subr.msk.mxu0 %vm443_vm8, %v1239_v42  ;;  %1193 = vmatprep.subr.msk.mxu1 %vm443_vm8, %v1239_v42 }
  0xb8   : > { %1066 = vmatpush3.msk.msra.mxu0 %vm427_vm9, %v1239_v42  ;;  %1209 = vmatpush3.msk.msra.mxu1 %vm427_vm9, %v1239_v42 }
  0xb9   : > { %v390_v0 = vpop.permute.xlu0 %389  ;;  %v342_v1 = vpop.permute.xlu1 %341 }
  0xba   : > { %vm442_vm10 = vcmp.eq.s32.totalorder %v1358_v43, %v390_v0  ;;  %vm426_vm11 = vcmp.eq.s32.totalorder %v1358_v43, %v342_v1 }
  0xbb   : > { %1067 = vmatprep.subr.msk.mxu0 %vm442_vm10, %v1239_v42  ;;  %1194 = vmatprep.subr.msk.mxu1 %vm442_vm10, %v1239_v42 }
  0xbc   : > { %1068 = vmatpush3.msk.msra.mxu0 %vm426_vm11, %v1239_v42  ;;  %1210 = vmatpush3.msk.msra.mxu1 %vm426_vm11, %v1239_v42 }
  0xbd   : > { %v387_v2 = vpop.permute.xlu0 %386  ;;  %v339_v3 = vpop.permute.xlu1 %338 }
  0xbe   : > { %vm441_vm12 = vcmp.eq.s32.totalorder %v1358_v43, %v387_v2  ;;  %vm425_vm13 = vcmp.eq.s32.totalorder %v1358_v43, %v339_v3 }
  0xbf   : > { %1069 = vmatprep.subr.msk.mxu0 %vm441_vm12, %v1239_v42  ;;  %1195 = vmatprep.subr.msk.mxu1 %vm441_vm12, %v1239_v42 }
  0xc0   : > { %1070 = vmatpush3.msk.msra.mxu0 %vm425_vm13, %v1239_v42  ;;  %1211 = vmatpush3.msk.msra.mxu1 %vm425_vm13, %v1239_v42 }
  0xc1   : > { %v384_v4 = vpop.permute.xlu0 %383  ;;  %v336_v5 = vpop.permute.xlu1 %335 }
  0xc2   : > { %vm440_vm14 = vcmp.eq.s32.totalorder %v1358_v43, %v384_v4  ;;  %vm424_vm15 = vcmp.eq.s32.totalorder %v1358_v43, %v336_v5 }
  0xc3   : > { %1071 = vmatprep.subr.msk.mxu0 %vm440_vm14, %v1239_v42  ;;  %1196 = vmatprep.subr.msk.mxu1 %vm440_vm14, %v1239_v42 }
  0xc4   : > { %1072 = vmatpush3.msk.msra.mxu0 %vm424_vm15, %v1239_v42  ;;  %1212 = vmatpush3.msk.msra.mxu1 %vm424_vm15, %v1239_v42 }
  0xc5   : > { %v381_v6 = vpop.permute.xlu0 %380  ;;  %v333_v7 = vpop.permute.xlu1 %332 }
  0xc6   : > { %vm439_vm0 = vcmp.eq.s32.totalorder %v1358_v43, %v381_v6  ;;  %vm423_vm1 = vcmp.eq.s32.totalorder %v1358_v43, %v333_v7 }
  0xc7   : > { %1073 = vmatprep.subr.msk.mxu0 %vm439_vm0, %v1239_v42  ;;  %1197 = vmatprep.subr.msk.mxu1 %vm439_vm0, %v1239_v42 }
  0xc8   : > { %1074 = vmatpush3.msk.msra.mxu0 %vm423_vm1, %v1239_v42  ;;  %1213 = vmatpush3.msk.msra.mxu1 %vm423_vm1, %v1239_v42 }
  0xc9   : > { %v378_v8 = vpop.permute.xlu0 %377  ;;  %v330_v9 = vpop.permute.xlu1 %329 }
  0xca   : > { %vm438_vm4 = vcmp.eq.s32.totalorder %v1358_v43, %v378_v8  ;;  %vm422_vm5 = vcmp.eq.s32.totalorder %v1358_v43, %v330_v9 }
  0xcb   : > { %1075 = vmatprep.subr.msk.mxu0 %vm438_vm4, %v1239_v42  ;;  %1198 = vmatprep.subr.msk.mxu1 %vm438_vm4, %v1239_v42 }
  0xcc   : > { %1076 = vmatpush3.msk.msra.mxu0 %vm422_vm5, %v1239_v42  ;;  %1214 = vmatpush3.msk.msra.mxu1 %vm422_vm5, %v1239_v42 }
  0xcd   : > { %v375_v10 = vpop.permute.xlu0 %374  ;;  %v327_v11 = vpop.permute.xlu1 %326 }
  0xce   : > { %vm437_vm6 = vcmp.eq.s32.totalorder %v1358_v43, %v375_v10  ;;  %vm421_vm7 = vcmp.eq.s32.totalorder %v1358_v43, %v327_v11 }
  0xcf   : > { %1077 = vmatprep.subr.msk.mxu0 %vm437_vm6, %v1239_v42  ;;  %1199 = vmatprep.subr.msk.mxu1 %vm437_vm6, %v1239_v42 }
  0xd0   : > { %1078 = vmatpush3.msk.msra.mxu0 %vm421_vm7, %v1239_v42  ;;  %1215 = vmatpush3.msk.msra.mxu1 %vm421_vm7, %v1239_v42 }
  0xd1   : > { %1034 = vmatmul.mubr.msk.f32.vlgmr.msra.gmra.mxu0 %vm529_vm2, %v1239_v42  ;;  %1036 = vmatmul.mubr.msk.f32.vlgmr.msra.gmra.mxu1 %vm531_vm3, %v1239_v42 }
 0x191   : > { %v1079_v12 = vpop.f32.mrf.mxu0  ;;  %v1082_v13 = vpop.f32.mrf.mxu1 }
 0x193   : > { %v1080_v15 = vpop.f32.mrf.mxu0  ;;  %v1083_v17 = vpop.f32.mrf.mxu1 }
 0x194   : > { %v1081_v18 = vadd.f32 %v1080_v15, %v1079_v12  ;;  %v1084_v19 = vadd.f32 %v1083_v17, %v1082_v13  ;;  %625 = sbr.rel (%p1037_p6) target bundleno = 1038 (0x40e), region = 56 }
 0x196   : > { %v618_v20 = vadd.f32 %v1081_v18, %v541_v14  ;;  %v619_v21 = vadd.f32 %v1084_v19, %v542_v16 }
 0x198   : > { %620 = vst [vmem:[#allocation2] sm:$0xff] %v618_v20  ;;  %621 = vst [vmem:[#allocation2 + $0x8] sm:$0xff] %v619_v21 }
 0x199   : > { %v643_v22 = vld [vmem:[%s1566_s2 + $0x78] sm:$0xff]  ;;  %v642_v23 = vld [vmem:[%s1566_s2 + $0x70] sm:$0xff]  ;;  %v641_v24 = vld [vmem:[%s1566_s2 + $0x68] sm:$0xff]  ;;  %vm838_vm2 = vcmask 1043456   ;;  %vm732_vm3 = vcmask 261120   ;;  %vm831_vm8 = vcmask 490496  }
 0x19a   : > { %1119 = vmatprep.subr.mxu0 %v643_v22  ;;  %v640_v25 = vld [vmem:[%s1566_s2 + $0x60] sm:$0xff]  ;;  %v639_v27 = vld [vmem:[%s1566_s2 + $0x58] sm:$0xff]  ;;  %v638_v29 = vld [vmem:[%s1566_s2 + $0x50] sm:$0xff]  ;;  %vm917_vm9 = vcmask 31744  }
 0x19b   : > { %1120 = vmatpush3.msra.mxu0 %v643_v22  ;;  %v724_v28 = vld [vmem:[%s1567_s3 + $0x18] sm:$0xff]  ;;  %v637_v30 = vld [vmem:[%s1566_s2 + $0x48] sm:$0xff]  ;;  %v636_v31 = vld [vmem:[%s1566_s2 + $0x40] sm:$0xff] }
 0x19c   : > { %1121 = vmatprep.subr.mxu0 %v642_v23  ;;  %1154 = vmatprep.subr.mxu1 %v724_v28  ;;  %v635_v32 = vld [vmem:[%s1566_s2 + $0x38] sm:$0xff]  ;;  %v634_v33 = vld [vmem:[%s1566_s2 + $0x30] sm:$0xff]  ;;  %v633_v34 = vld [vmem:[%s1566_s2 + $0x28] sm:$0xff] }
 0x19d   : > { %1122 = vmatpush3.msra.mxu0 %v642_v23  ;;  %1155 = vmatpush3.msra.mxu1 %v724_v28  ;;  %v632_v35 = vld [vmem:[%s1566_s2 + $0x20] sm:$0xff]  ;;  %v631_v36 = vld [vmem:[%s1566_s2 + $0x18] sm:$0xff]  ;;  %v630_v37 = vld [vmem:[%s1566_s2 + $0x10] sm:$0xff] }
 0x19e   : > { %1123 = vmatprep.subr.mxu0 %v641_v24  ;;  %v629_v38 = vld [vmem:[%s1566_s2 + $0x8] sm:$0xff]  ;;  %v628_v39 = vld [vmem:[%s1566_s2] sm:$0xff]  ;;  %v723_v41 = vld [vmem:[%s1567_s3 + $0x10] sm:$0xff] }
 0x19f   : > { %v626_v26 = vld [vmem:[#allocation2] sm:$0xff]  ;;  %1124 = vmatpush3.msra.mxu0 %v641_v24  ;;  %v627_v40 = vld [vmem:[#allocation2 + $0x8] sm:$0xff]  ;;  %1156 = vmatprep.subr.mxu1 %v723_v41  ;;  %v823_v44 = vld [vmem:[%s1569_s5 + $0x38] sm:$0xf] }
 0x1a0   : > { %1151 = vmatprep.mubr.f32.mxu0 %v626_v26  ;;  %1125 = vmatprep.subr.mxu0 %v640_v25  ;;  %v722_v42 = vld [vmem:[%s1567_s3 + $0x8] sm:$0xff]  ;;  %v721_v43 = vld [vmem:[%s1567_s3] sm:$0xff]  ;;  %v822_v49 = vld [vmem:[%s1569_s5 + $0x30] sm:$0xff] }
 0x1a1   : > { %1126 = vmatpush3.msra.mxu0 %v640_v25  ;;  %1157 = vmatpush3.msra.mxu1 %v723_v41  ;;  %v821_v50 = vld [vmem:[%s1569_s5 + $0x28] sm:$0xff]  ;;  %v820_v51 = vld [vmem:[%s1569_s5 + $0x20] sm:$0xff]  ;;  %v819_v52 = vld [vmem:[%s1569_s5 + $0x18] sm:$0xff] }
 0x1a2   : > { %1127 = vmatprep.subr.mxu0 %v639_v27  ;;  %1158 = vmatprep.subr.mxu1 %v722_v42  ;;  %v818_v53 = vld [vmem:[%s1569_s5 + $0x10] sm:$0xff]  ;;  %v817_v54 = vld [vmem:[%s1569_s5 + $0x8] sm:$0xff]  ;;  %v816_v55 = vld [vmem:[%s1569_s5] sm:$0xff] }
 0x1a3   : > { %1128 = vmatpush3.msra.mxu0 %v639_v27  ;;  %1159 = vmatpush3.msra.mxu1 %v722_v42  ;;  %v1038_v56 = vld [vmem:[%s1568_s4] ss:$0 sm:$0xff] }
 0x1a4   : > { %1129 = vmatprep.subr.mxu0 %v638_v29  ;;  %1160 = vmatprep.subr.mxu1 %v721_v43  ;;  %v1041_v63 = vld [vmem:[%s1570_s6] ss:$0 sm:$0xff] }
 0x1a5   : > { %1130 = vmatpush3.msra.mxu0 %v638_v29  ;;  %1161 = vmatpush3.msra.mxu1 %v721_v43 }
 0x1a6   : > { %1131 = vmatprep.subr.mxu0 %v637_v30  ;;  %1165 = vmatprep.subr.msk.mxu1 %vm838_vm2, %v823_v44 }
 0x1a7   : > { %1132 = vmatpush3.msra.mxu0 %v637_v30 }
 0x1a8   : > { %1133 = vmatprep.subr.mxu0 %v636_v31 }
 0x1a9   : > { %1134 = vmatpush3.msra.mxu0 %v636_v31 }
 0x1aa   : > { %1135 = vmatprep.subr.mxu0 %v635_v32 }
 0x1ab   : > { %1136 = vmatpush3.msra.mxu0 %v635_v32 }
 0x1ac   : > { %1137 = vmatprep.subr.mxu0 %v634_v33 }
 0x1ad   : > { %1138 = vmatpush3.msra.mxu0 %v634_v33 }
 0x1ae   : > { %1139 = vmatprep.subr.mxu0 %v633_v34 }
 0x1af   : > { %1140 = vmatpush3.msra.mxu0 %v633_v34 }
 0x1b0   : > { %1141 = vmatprep.subr.mxu0 %v632_v35 }
 0x1b1   : > { %1142 = vmatpush3.msra.mxu0 %v632_v35 }
 0x1b2   : > { %1143 = vmatprep.subr.mxu0 %v631_v36 }
 0x1b3   : > { %1144 = vmatpush3.msra.mxu0 %v631_v36 }
 0x1b4   : > { %1145 = vmatprep.subr.mxu0 %v630_v37 }
 0x1b5   : > { %1146 = vmatpush3.msra.mxu0 %v630_v37 }
 0x1b6   : > { %1147 = vmatprep.subr.mxu0 %v629_v38 }
 0x1b7   : > { %1148 = vmatpush3.msra.mxu0 %v629_v38 }
 0x1b8   : > { %1149 = vmatprep.subr.mxu0 %v628_v39 }
 0x1b9   : > { %1150 = vmatpush3.msra.mxu0 %v628_v39 }
 0x1ba   : > { %1152 = vmatmul.mubr.f32.vlgmr.msra.gmra.mxu0 %v627_v40 }
 0x27a   : > { %v1153_v45 = vpop.f32.mrf.mxu0 }
 0x27b   : > { %v720_v48 = vmul.f32 0.025, %v1153_v45 }
 0x27c   : > { %v710_v46 = vpop.f32.mrf.mxu0 }
 0x27d   : > { %v719_v47 = vmul.f32 0.025, %v710_v46 }
 0x27f   : > { %1162 = vmatprep.mubr.msk.f32.mxu1 %vm732_vm3, %v719_v47 }
 0x280   : > { %1163 = vmatmul.mubr.msk.f32.vlgmr.msra.gmra.mxu1 %vm732_vm3, %v720_v48 }
 0x281   : > { %1166 = vmatpush3.msk.msra.mxu1 %vm838_vm2, %v823_v44 }
 0x282   : > { %1167 = vmatprep.subr.mxu1 %v822_v49 }
 0x283   : > { %1168 = vmatpush3.msra.mxu1 %v822_v49 }
 0x284   : > { %1169 = vmatprep.subr.mxu1 %v821_v50 }
 0x285   : > { %1170 = vmatpush3.msra.mxu1 %v821_v50 }
 0x286   : > { %1171 = vmatprep.subr.mxu1 %v820_v51 }
 0x287   : > { %1172 = vmatpush3.msra.mxu1 %v820_v51 }
 0x288   : > { %1173 = vmatprep.subr.mxu1 %v819_v52 }
 0x289   : > { %1174 = vmatpush3.msra.mxu1 %v819_v52 }
 0x28a   : > { %1175 = vmatprep.subr.mxu1 %v818_v53 }
 0x28b   : > { %1176 = vmatpush3.msra.mxu1 %v818_v53 }
 0x28c   : > { %1177 = vmatprep.subr.mxu1 %v817_v54 }
 0x28d   : > { %1178 = vmatpush3.msra.mxu1 %v817_v54 }
 0x28e   : > { %1179 = vmatprep.subr.mxu1 %v816_v55 }
 0x28f   : > { %1180 = vmatpush3.msra.mxu1 %v816_v55 }
 0x340   : > { %v1164_v57 = vpop.f32.mrf.mxu1 }
 0x341   : > { %v811_v58 = vadd.f32 %v1164_v57, %v1038_v56 }
 0x342   : > { %v805_v59 = vpop.f32.mrf.mxu1 }
 0x343   : > { %v806_v60 = vadd.f32 %v1038_v56, %v805_v59  ;;  %v815_v62 = vmax.f32 %v811_v58, 0.0 }
 0x345   : > { %v814_v61 = vmax.f32 %v806_v60, 0.0 }
 0x347   : > { %1181 = vmatprep.mubr.msk.f32.mxu1 %vm831_vm8, %v814_v61 }
 0x348   : > { %1182 = vmatmul.mubr.msk.f32.vlgmr.msra.gmra.mxu1 %vm831_vm8, %v815_v62 }
 0x408   : > { %v1183_v0 = vpop.f32.mrf.mxu1 }
 0x409   : > { %v914_v1 = vadd.f32 %v1183_v0, %v1041_v63 }
 0x40a   : > { %v908_v2 = vpop.f32.mrf.mxu1 }
 0x40b   : > { %919 = vst.msk [vmem:[%s1571_s7 + $0x8] sm:$0xff] %vm917_vm9, %v914_v1  ;;  %v909_v3 = vadd.f32 %v1041_v63, %v908_v2 }
 0x40d   : > { %918 = vst.msk [vmem:[%s1571_s7] sm:$0xff] %vm917_vm9, %v909_v3 }
 0x40e PF: > { %s17_s24 = sadd.s32 1, %s1235_s24  }
 0x40f   : > { %p14_p7 = scmp.ge.s32.totalorder %s17_s24, 5  }
 0x411   :  { %16 = sbr.rel (!%p14_p7) target bundleno = 1 (0x1), region = 85 }

</bundles_post_ra>
